<compile_context>
chip_gen: v7x
topology: tpu7x:2x2x1
jax: 0.10.0
libtpu: 0.0.40
codegen_flags: <defaults>
</compile_context>

<pallas_src>
import jax
import jax.numpy as jnp
from jax.experimental import pallas as pl
from jax.experimental.pallas import tpu as pltpu


def _rn_kernel(x_ref, w1_ref, b1_ref, w2_ref, b2_ref, out_ref):
    # fc1 on the MXU with f32 accumulation. x is cast to w1's dtype in-kernel
    # (no-op for f32; bf16 when mxu_dtype=bf16) so the HBM copy of x is never rewritten.
    x = x_ref[...].astype(w1_ref.dtype)
    h = jnp.dot(x, w1_ref[...], preferred_element_type=jnp.float32)
    h = jnp.maximum(h + b1_ref[...], 0.0)                               # (tb, Hp) f32
    # fc2 also on the MXU: w2_ref is (Hp, 128) with the real weights in column 0, so
    # this is a standard (tb,128)@(128,128) matmul -- no cross-lane XLU reduce.
    o = jnp.dot(h, w2_ref[...], preferred_element_type=jnp.float32)     # (tb, 128)
    out_ref[...] = (o[:, 0:1] + b2_ref[0, 0]).astype(out_ref.dtype)


def _rn_part(x_part, w1p, b1p, w2p, b2s, *, tb, grid_b, out_dtype, vmem_limit_bytes):
    """Run the fused kernel over the first grid_b * tb rows of x_part."""
    D = x_part.shape[1]
    Hp = w1p.shape[1]
    rows = grid_b * tb
    return pl.pallas_call(
        _rn_kernel,
        out_shape=jax.ShapeDtypeStruct((rows, 1), out_dtype),
        grid_spec=pltpu.PrefetchScalarGridSpec(
            num_scalar_prefetch=0,
            grid=(grid_b,),
            in_specs=[
                pl.BlockSpec((tb, D), lambda i: (i, 0)),      # x: pipelined batch tiles
                pl.BlockSpec((D, Hp), lambda i: (0, 0)),      # w1: VMEM-resident
                pl.BlockSpec((1, Hp), lambda i: (0, 0)),      # b1: VMEM-resident
                pl.BlockSpec((Hp, 128), lambda i: (0, 0)),    # w2 (padded): VMEM-resident
                pl.BlockSpec(memory_space=pltpu.MemorySpace.SMEM),  # b2 scalar in SMEM
            ],
            out_specs=pl.BlockSpec((tb, 1), lambda i: (i, 0)),
        ),
        compiler_params=pltpu.CompilerParams(
            dimension_semantics=("parallel",),   # batch tiles independent (2 TCs on v7x)
            vmem_limit_bytes=vmem_limit_bytes,
        ),
    )(x_part, w1p, b1p, w2p, b2s)


def relation_network(x, w1, b1, w2, b2, *, block_b=4096, mxu_dtype=None,
                     vmem_limit_bytes=32 * 1024 * 1024):
    """Fused RelationNetwork forward:  relu(x @ w1 + b1) @ w2 + b2  -> [B, 1].

    x: [B, D]; w1: [D, H] ([in, out], i.e. transposed vs torch); b1: [H] or [1, H];
    w2: [H, 1] or [H]; b2: scalar-like. Optional mxu_dtype (e.g. jnp.bfloat16) makes
    the fc1 matmul ingest bf16 operands (w1 cast once in the wrapper, x cast in-kernel)
    while keeping f32 accumulation.
    """
    assert block_b % 128 == 0 and block_b >= 128, "block_b must be a multiple of 128"
    B, D = x.shape
    H = w1.shape[1]
    out_dtype = x.dtype

    # ---- pad hidden dim to full 128-lane tiles (zeros are numerically exact) ----
    Hp = ((H + 127) // 128) * 128
    w1c = w1.astype(mxu_dtype) if mxu_dtype is not None else w1
    w1p = jnp.pad(w1c, ((0, 0), (0, Hp - H)))
    b1p = jnp.pad(jnp.reshape(b1, (1, H)).astype(jnp.float32), ((0, 0), (0, Hp - H)))
    w2col = jnp.reshape(w2, (H,)).astype(jnp.float32)
    w2p = jnp.zeros((Hp, 128), jnp.float32).at[:H, 0].set(w2col)   # real weights in col 0
    b2s = jnp.reshape(b2, (1, 1)).astype(jnp.float32)

    # ---- batch tiling: big tiles, >= 2 grid steps when possible, tail handled apart ----
    if B >= 256:
        tb = max(128, min(block_b, ((B // 2) // 128) * 128))   # guarantees grid_b >= 2
        grid_b = B // tb
        b_main = grid_b * tb
    else:
        tb, grid_b, b_main = 0, 0, 0
    b_tail = B - b_main

    parts = []
    if grid_b > 0:
        # Main call reads the first b_main rows of x in place -- no padding copy of x.
        parts.append(_rn_part(x, w1p, b1p, w2p, b2s, tb=tb, grid_b=grid_b,
                              out_dtype=out_dtype, vmem_limit_bytes=vmem_limit_bytes))
    if b_tail > 0:
        # Tail: pad ONLY the <= tb remaining rows up to a multiple of 8 sublanes.
        tt = ((b_tail + 7) // 8) * 8
        x_tail = x[b_main:B, :]
        if tt != b_tail:
            x_tail = jnp.pad(x_tail, ((0, tt - b_tail), (0, 0)))
        out_tail = _rn_part(x_tail, w1p, b1p, w2p, b2s, tb=tt, grid_b=1,
                            out_dtype=out_dtype, vmem_limit_bytes=vmem_limit_bytes)
        parts.append(out_tail[:b_tail])

    out = parts[0] if len(parts) == 1 else jnp.concatenate(parts, axis=0)
    return out


if __name__ == "__main__":
    # Shapes consistent with the module: input_size=64, hidden_size=32.
    batch, input_size, hidden_size = 8, 64, 32

    key = jax.random.PRNGKey(0)
    kx, kw1, kb1, kw2, kb2, kx2 = jax.random.split(key, 6)

    x = jax.random.normal(kx, (batch, input_size), dtype=jnp.float32)

    # PyTorch Linear default init: U(-1/sqrt(fan_in), 1/sqrt(fan_in)); weights stored [in, out].
    lim1 = 1.0 / jnp.sqrt(input_size)
    lim2 = 1.0 / jnp.sqrt(hidden_size)
    w1 = jax.random.uniform(kw1, (input_size, hidden_size), jnp.float32, -lim1, lim1)
    b1 = jax.random.uniform(kb1, (1, hidden_size), jnp.float32, -lim1, lim1)
    w2 = jax.random.uniform(kw2, (hidden_size, 1), jnp.float32, -lim2, lim2)
    b2 = jax.random.uniform(kb2, (1, 1), jnp.float32, -lim2, lim2)

    def ref_fwd(xx):
        return jnp.maximum(xx @ w1 + b1, 0.0) @ w2 + b2

    # 1) Small batch: tail-only single-tile path.
    out = jax.block_until_ready(relation_network(x, w1, b1, w2, b2))
    assert out.shape == (batch, 1)
    assert jnp.allclose(out, ref_fwd(x), atol=1e-4, rtol=1e-4)

    # 2) Mid batch (B=300): 2 'parallel' main tiles + padded tail call; no full-x pad.
    B2 = 300
    x2 = jax.random.normal(kx2, (B2, input_size), dtype=jnp.float32)
    out2 = jax.block_until_ready(relation_network(x2, w1, b1, w2, b2))
    assert out2.shape == (B2, 1)
    assert jnp.allclose(out2, ref_fwd(x2), atol=1e-4, rtol=1e-4)

    # 3) bf16 MXU-ingest path (in-kernel cast of x; f32 accumulation retained).
    out2_bf16 = jax.block_until_ready(
        relation_network(x2, w1, b1, w2, b2, mxu_dtype=jnp.bfloat16))
    assert out2_bf16.shape == (B2, 1)
    assert jnp.allclose(out2_bf16, ref_fwd(x2), atol=5e-2, rtol=5e-2)

    print("KERNEL_OK")
</pallas_src>

<mosaic_0001>
module attributes {stable_mosaic.version = 11 : i64} {
  func.func @_rn_kernel(%arg0: i32, %arg1: memref<8x64xf32, #tpu.memory_space<vmem>>, %arg2: memref<64x128xf32, #tpu.memory_space<vmem>>, %arg3: memref<1x128xf32, #tpu.memory_space<vmem>>, %arg4: memref<128x128xf32, #tpu.memory_space<vmem>>, %arg5: memref<1x1xf32, #tpu.memory_space<smem>>, %arg6: memref<8x1xf32, #tpu.memory_space<vmem>>) attributes {dimension_semantics = [#tpu.dimension_semantics<parallel>], iteration_bounds = array<i64: 1>, scalar_prefetch = 0 : i64, scratch_operands = 0 : i64, tpu.core_type = #tpu.core_type<tc>, window_params = [{transform_indices = @transform_0, window_bounds = array<i64: 8, 64>}, {pipeline_mode = #tpu.pipeline_mode<synchronous>, transform_indices = @transform_1, window_bounds = array<i64: 64, 128>}, {pipeline_mode = #tpu.pipeline_mode<synchronous>, transform_indices = @transform_2, window_bounds = array<i64: 1, 128>}, {pipeline_mode = #tpu.pipeline_mode<synchronous>, transform_indices = @transform_3, window_bounds = array<i64: 128, 128>}, {transform_indices = @transform_4, window_bounds = array<i64: 1, 1>}, {transform_indices = @transform_5, window_bounds = array<i64: 8, 1>}]} {
    %c0 = arith.constant 0 : index
    %c0_0 = arith.constant 0 : index
    %0 = vector.load %arg1[%c0, %c0_0] : memref<8x64xf32, #tpu.memory_space<vmem>>, vector<8x64xf32>
    %c0_1 = arith.constant 0 : index
    %c0_2 = arith.constant 0 : index
    %1 = vector.load %arg2[%c0_1, %c0_2] : memref<64x128xf32, #tpu.memory_space<vmem>>, vector<64x128xf32>
    %cst = arith.constant dense<0.000000e+00> : vector<8x128xf32>
    %2 = tpu.matmul %0, %1, %cst {dimension_numbers = #tpu.dot_dimension_numbers<[1], [0], [0], [1], [0, 0, 1, 1], [], []>} : vector<8x64xf32>, vector<64x128xf32>, vector<8x128xf32> -> vector<8x128xf32>
    %c0_3 = arith.constant 0 : index
    %c0_4 = arith.constant 0 : index
    %3 = vector.load %arg3[%c0_3, %c0_4] : memref<1x128xf32, #tpu.memory_space<vmem>>, vector<1x128xf32>
    %4 = vector.broadcast %3 : vector<1x128xf32> to vector<8x128xf32>
    %5 = arith.addf %2, %4 : vector<8x128xf32>
    %cst_5 = arith.constant 0.000000e+00 : f32
    %6 = vector.broadcast %cst_5 : f32 to vector<8x128xf32>
    %7 = arith.maximumf %5, %6 : vector<8x128xf32>
    %c0_6 = arith.constant 0 : index
    %c0_7 = arith.constant 0 : index
    %8 = vector.load %arg4[%c0_6, %c0_7] : memref<128x128xf32, #tpu.memory_space<vmem>>, vector<128x128xf32>
    %cst_8 = arith.constant dense<0.000000e+00> : vector<8x128xf32>
    %9 = tpu.matmul %7, %8, %cst_8 {dimension_numbers = #tpu.dot_dimension_numbers<[1], [0], [0], [1], [0, 0, 1, 1], [], []>} : vector<8x128xf32>, vector<128x128xf32>, vector<8x128xf32> -> vector<8x128xf32>
    %10 = vector.extract_strided_slice %9 {offsets = [0, 0], sizes = [8, 1], strides = [1, 1]} : vector<8x128xf32> to vector<8x1xf32>
    %c0_9 = arith.constant 0 : index
    %c0_10 = arith.constant 0 : index
    %11 = memref.load %arg5[%c0_9, %c0_10] : memref<1x1xf32, #tpu.memory_space<smem>>
    %12 = vector.broadcast %11 : f32 to vector<8x1xf32>
    %13 = arith.addf %10, %12 : vector<8x1xf32>
    %c0_11 = arith.constant 0 : index
    %c0_12 = arith.constant 0 : index
    %14 = vector.load %arg6[%c0_11, %c0_12] : memref<8x1xf32, #tpu.memory_space<vmem>>, vector<8x1xf32>
    tpu.vector_store %arg6[%c0_11, %c0_12], %13 {strides = array<i32>} : memref<8x1xf32, #tpu.memory_space<vmem>>, vector<8x1xf32>,
    return
  }
  func.func @transform_0(%arg0: i32) -> (i32, i32) {
    %c0_i32 = arith.constant 0 : i32
    %c0_i32_0 = arith.constant 0 : i32
    return %arg0, %c0_i32 : i32, i32
  }
  func.func @transform_1(%arg0: i32) -> (i32, i32) {
    %c0_i32 = arith.constant 0 : i32
    %c0_i32_0 = arith.constant 0 : i32
    %c0_i32_1 = arith.constant 0 : i32
    return %c0_i32, %c0_i32_0 : i32, i32
  }
  func.func @transform_2(%arg0: i32) -> (i32, i32) {
    %c0_i32 = arith.constant 0 : i32
    %c0_i32_0 = arith.constant 0 : i32
    %c0_i32_1 = arith.constant 0 : i32
    return %c0_i32, %c0_i32_0 : i32, i32
  }
  func.func @transform_3(%arg0: i32) -> (i32, i32) {
    %c0_i32 = arith.constant 0 : i32
    %c0_i32_0 = arith.constant 0 : i32
    %c0_i32_1 = arith.constant 0 : i32
    return %c0_i32, %c0_i32_0 : i32, i32
  }
  func.func @transform_4(%arg0: i32) -> (i32, i32) {
    %c0_i32 = arith.constant 0 : i32
    %c0_i32_0 = arith.constant 0 : i32
    %c0_i32_1 = arith.constant 0 : i32
    return %c0_i32, %c0_i32_0 : i32, i32
  }
  func.func @transform_5(%arg0: i32) -> (i32, i32) {
    %c0_i32 = arith.constant 0 : i32
    %c0_i32_0 = arith.constant 0 : i32
    return %arg0, %c0_i32 : i32, i32
  }
}

</mosaic_0001>

<bundles_post_ra>
// kernel: tpu_custom_call.1
= control target key start
LH: loop header
LB: loop body
LE: loop exit
PB: predicated region body
PF: predicated region fallthrough
CT: control target
= control target key end

     0   :  { %11 = vsyncpa [#allocation4], 0  ;;  %s533_s0 = inlined_call_operand.hbm [shape: f32[8,64], index: 0, kind: input, shape index: {}]   ;;  %s534_s1 = inlined_call_operand.hbm [shape: f32[64,128], index: 1, kind: input, shape index: {}]   ;;  %s535_s2 = inlined_call_operand.vmem [shape: f32[1,128], index: 2, kind: input, shape index: {}]   ;;  %s536_s3 = inlined_call_operand.hbm [shape: f32[128,128], index: 3, kind: input, shape index: {}]   ;;  %s537_s4 = inlined_call_operand.<no memory space> [shape: f32[1,1], index: 4, kind: input, shape index: {}]   ;;  %s538_s5 = inlined_call_operand.vmem [shape: f32[8,1], index: 5, kind: output, shape index: {}]  }
   0x1   :  { %12 = vsyncpa [#allocation6], 0  ;;  %s444_s18 = smov [#allocation5]   ;;  %s374_s22 = scalar_lea.hbm %s534_s1, 1024 }
   0x2   :  { %s28_s19 = sshll.u32 %s444_s18, 4  ;;  %p375_p0 = scmp.ne.s32.totalorder %s534_s1, %s374_s22  ;;  %s29_s19 = int_to_ptr.vmem [resolvable:$true] %s28_s19 }
   0x3   :  { %p378_p1 = scmp.lt.u32.totalorder %s374_s22, %s534_s1 }
   0x5   :  { %p380_p2 = pnand %p378_p1, %p375_p0 }
   0x7   :  { %383 = shalt.err (!%p380_p2)
}
   0x8   :  { %s384_s27 = scalar_lea.vmem %s29_s19, 1024  ;;  %p389_p4 = scmp.lt.s32.totalorder %s29_s19, %s29_s19 }
   0x9   :  { %p385_p3 = scmp.ne.s32.totalorder %s29_s19, %s384_s27  ;;  %p390_p5 = scmp.lt.s32.totalorder %s384_s27, %s384_s27 }
   0xb   :  { %p391_p6 = por %p390_p5, %p389_p4 }
   0xd   :  { %p392_p7 = pnand %p391_p6, %p385_p3 }
   0xf   :  { %395 = shalt.err (!%p392_p7)
}
  0x10   :  { %s445_s28 = smov 128   ;;  %s446_s29 = smov 8  }
  0x11   :  { %34 = dma.hbm_to_vmem [thread:$0]  %s534_s1, 1024, %s29_s19, [#allocation6], %s445_s28, %s445_s28, %s446_s29  }
  0x12   :  { %s447_s7 = smov [#allocation3]   ;;  %s448_s9 = smov [#allocation7]  }
  0x13   :  { %s19_s8 = sshll.u32 %s447_s7, 4  ;;  %s42_s10 = sshll.u32 %s448_s9, 4  ;;  %s20_s8 = int_to_ptr.vmem [resolvable:$true] %s19_s8  ;;  %s43_s10 = int_to_ptr.vmem [resolvable:$true] %s42_s10 }
  0x14   :  { %s396_s13 = scalar_lea.hbm %s533_s0, 128 }
  0x15   :  { %p397_p8 = scmp.ne.s32.totalorder %s533_s0, %s396_s13  ;;  %p400_p9 = scmp.lt.u32.totalorder %s396_s13, %s533_s0 }
  0x17   :  { %p402_p10 = pnand %p400_p9, %p397_p8 }
  0x19   :  { %405 = shalt.err (!%p402_p10)
}
  0x1a   :  { %s406_s1 = scalar_lea.vmem %s20_s8, 128  ;;  %p411_p12 = scmp.lt.s32.totalorder %s20_s8, %s20_s8 }
  0x1b   :  { %p407_p11 = scmp.ne.s32.totalorder %s20_s8, %s406_s1  ;;  %p412_p13 = scmp.lt.s32.totalorder %s406_s1, %s406_s1 }
  0x1d   :  { %p413_p0 = por %p412_p13, %p411_p12 }
  0x1f   :  { %p414_p1 = pnand %p413_p0, %p407_p11 }
  0x21   :  { %417 = shalt.err (!%p414_p1)
}
  0x22   :  { %22 = dma.hbm_to_vmem [thread:$0]  %s533_s0, 128, %s20_s8, [#allocation4]  }
  0x23   :  { %s418_s22 = scalar_lea.hbm %s536_s3, 2048 }
  0x24   :  { %p419_p2 = scmp.ne.s32.totalorder %s536_s3, %s418_s22  ;;  %p422_p3 = scmp.lt.u32.totalorder %s418_s22, %s536_s3 }
  0x26   :  { %p424_p4 = pnand %p422_p3, %p419_p2 }
  0x28   :  { %427 = shalt.err (!%p424_p4)
}
  0x29   :  { %s428_s27 = scalar_lea.vmem %s43_s10, 2048  ;;  %p433_p6 = scmp.lt.s32.totalorder %s43_s10, %s43_s10 }
  0x2a   :  { %p429_p5 = scmp.ne.s32.totalorder %s43_s10, %s428_s27  ;;  %p434_p7 = scmp.lt.s32.totalorder %s428_s27, %s428_s27 }
  0x2c   :  { %p435_p8 = por %p434_p7, %p433_p6 }
  0x2e   :  { %p436_p9 = pnand %p435_p8, %p429_p5 }
  0x30   :  { %439 = shalt.err (!%p436_p9)
}
  0x31   :  { %48 = dma.hbm_to_vmem [thread:$0]  %s536_s3, 2048, %s43_s10, [#allocation6], %s445_s28, %s445_s28, %s446_s29  }
  0x32   :  { %440 = dma.done.wait [#allocation4], 128  }
  0x33   :  { %441 = vsyncadd [#allocation4], 4294967168 }
  0x34   :  { %442 = dma.done.wait [#allocation6], 3072  }
  0x35   :  { %443 = vsyncadd [#allocation6], 4294964224  ;;  %v449_v0 = vmov 0.0|0.0   ;;  %vm450_vm0 = vmmov 0   ;;  %v451_v1 = vmov 0.0   ;;  %v61_v2 = vld [vmem:[#allocation5] sm:$0xff]  ;;  %v238_v44 = vstv %s537_s4 }
  0x36   :  { %330 = vmatprep.subr.bf16.mxu0 %v449_v0  ;;  %292 = vmatprep.mubr.msk.f32.mxu0 %vm450_vm0, %v451_v1  ;;  %v62_v3 = vld [vmem:[#allocation5 + $0x8] sm:$0xff]  ;;  %v63_v4 = vld [vmem:[#allocation5 + $0x10] sm:$0xff]  ;;  %v64_v6 = vld [vmem:[#allocation5 + $0x18] sm:$0xff]  ;;  %vm76_vm1 = vcmask 523264   ;;  %vm240_vm2 = vcmask 7168  }
  0x37   :  { %342 = vmatprep.subr.bf16.mxu1 %v449_v0  ;;  %327 = vmatprep.mubr.msk.f32.mxu1 %vm450_vm0, %v451_v1  ;;  %v331_v5 = vpack.c.bf16 %v62_v3, %v61_v2  ;;  %v334_v7 = vpack.c.bf16 %v64_v6, %v63_v4  ;;  %v151_v8 = vld [vmem:[#allocation7] sm:$0xff]  ;;  %v152_v9 = vld [vmem:[#allocation7 + $0x8] sm:$0xff]  ;;  %v153_v10 = vld [vmem:[#allocation7 + $0x10] sm:$0xff] }
  0x38   :  { %v65_v11 = vld [vmem:[#allocation5 + $0x20] sm:$0xff]  ;;  %v66_v12 = vld [vmem:[#allocation5 + $0x28] sm:$0xff]  ;;  %v343_v13 = vpack.c.bf16 %v152_v9, %v151_v8  ;;  %v154_v14 = vld [vmem:[#allocation7 + $0x18] sm:$0xff] }
  0x39   :  { %332 = vmatpush3.bf16.msra.mxu0 %v331_v5  ;;  %v346_v15 = vpack.c.bf16 %v154_v14, %v153_v10  ;;  %v337_v16 = vpack.c.bf16 %v66_v12, %v65_v11  ;;  %v155_v17 = vld [vmem:[#allocation7 + $0x20] sm:$0xff]  ;;  %v156_v18 = vld [vmem:[#allocation7 + $0x28] sm:$0xff]  ;;  %v67_v19 = vld [vmem:[#allocation5 + $0x30] sm:$0xff] }
  0x3a   :  { %333 = vmatprep.subr.bf16.mxu0 %v449_v0  ;;  %344 = vmatpush3.bf16.msra.mxu1 %v343_v13  ;;  %v68_v20 = vld [vmem:[#allocation5 + $0x38] sm:$0xff]  ;;  %v349_v21 = vpack.c.bf16 %v156_v18, %v155_v17  ;;  %v157_v23 = vld [vmem:[#allocation7 + $0x30] sm:$0xff]  ;;  %v159_v27 = vld [vmem:[#allocation7 + $0x40] sm:$0xff] }
  0x3b   :  { %345 = vmatprep.subr.bf16.mxu1 %v449_v0  ;;  %v340_v22 = vpack.c.bf16 %v68_v20, %v67_v19  ;;  %v158_v24 = vld [vmem:[#allocation7 + $0x38] sm:$0xff]  ;;  %v160_v28 = vld [vmem:[#allocation7 + $0x48] sm:$0xff]  ;;  %v161_v30 = vld [vmem:[#allocation7 + $0x50] sm:$0xff] }
  0x3c   :  { %v352_v25 = vpack.c.bf16 %v158_v24, %v157_v23  ;;  %v60_v26 = vld [vmem:[#allocation3] sm:$0xff]  ;;  %v355_v29 = vpack.c.bf16 %v160_v28, %v159_v27  ;;  %v163_v33 = vld [vmem:[#allocation7 + $0x60] sm:$0xff]  ;;  %v164_v34 = vld [vmem:[#allocation7 + $0x68] sm:$0xff] }
  0x3d   :  { %335 = vmatpush3.bf16.msra.mxu0 %v334_v7  ;;  %v162_v31 = vld [vmem:[#allocation7 + $0x58] sm:$0xff]  ;;  %v361_v35 = vpack.c.bf16 %v164_v34, %v163_v33  ;;  %v165_v36 = vld [vmem:[#allocation7 + $0x70] sm:$0xff] }
  0x3e   :  { %336 = vmatprep.subr.bf16.mxu0 %v449_v0  ;;  %347 = vmatpush3.bf16.msra.mxu1 %v346_v15  ;;  %v358_v32 = vpack.c.bf16 %v162_v31, %v161_v30  ;;  %v166_v37 = vld [vmem:[#allocation7 + $0x78] sm:$0xff] }
  0x3f   :  { %348 = vmatprep.subr.bf16.mxu1 %v449_v0  ;;  %v364_v38 = vpack.c.bf16 %v166_v37, %v165_v36  ;;  %v248_v39 = vld [vmem:[%s535_s2] ss:$0 sm:$0xff] }
  0x41   :  { %338 = vmatpush3.bf16.msra.mxu0 %v337_v16 }
  0x42   :  { %339 = vmatprep.subr.bf16.mxu0 %v449_v0  ;;  %350 = vmatpush3.bf16.msra.mxu1 %v349_v21 }
  0x43   :  { %351 = vmatprep.subr.bf16.mxu1 %v449_v0 }
  0x45   :  { %341 = vmatpush3.bf16.msra.mxu0 %v340_v22 }
  0x46   :  { %353 = vmatpush3.bf16.msra.mxu1 %v352_v25 }
  0x47   :  { %354 = vmatprep.subr.bf16.mxu1 %v449_v0 }
  0x48   :  { %293 = vmatmul.mubr.msk.f32.vlgmr.msra.gmra.mrb[0].mxu0 %vm76_vm1, %v60_v26 }
  0x4a   :  { %356 = vmatpush3.bf16.msra.mxu1 %v355_v29 }
  0x4b   :  { %357 = vmatprep.subr.bf16.mxu1 %v449_v0 }
  0x4e   :  { %359 = vmatpush3.bf16.msra.mxu1 %v358_v32 }
  0x4f   :  { %360 = vmatprep.subr.bf16.mxu1 %v449_v0 }
  0x52   :  { %362 = vmatpush3.bf16.msra.mxu1 %v361_v35 }
  0x53   :  { %363 = vmatprep.subr.bf16.mxu1 %v449_v0 }
  0x56   :  { %365 = vmatpush3.bf16.msra.mxu1 %v364_v38 }
 0x11b   :  { %v146_v40 = vpop.f32.mrb[0].mxu0 }
 0x11c   :  { %v147_v41 = vadd.f32 %v248_v39, %v146_v40  ;;  %v294_v42 = vpop.f32.mrb[1].mxu0 }
 0x11e   :  { %v150_v43 = vmax.f32 %v147_v41, 0.0 }
 0x120   :  { %328 = vmatmul.mubr.f32.vlgmr.msra.gmra.mrb[0].mxu1 %v150_v43 }
 0x1f3   :  { %v233_v45 = vpop.f32.mrb[0].mxu1 }
 0x1f4   :  { %v239_v46 = vadd.f32 %v238_v44, %v233_v45  ;;  %v329_v47 = vpop.f32.mrb[1].mxu1 }
 0x1f6   :  { %241 = vst.msk [vmem:[%s538_s5] sm:$0xff] %vm240_vm2, %v239_v46 }
 0x1f7   :  { %246 = vsyncpa [#allocation4], 1 }
 0x1f8   :  { %247 = vsyncpa [#allocation6], 1 }

</bundles_post_ra>
